<compile_context>
chip_gen: v6e
topology: v6e:2x2x1
jax: 0.10.0
libtpu: 0.0.40
codegen_flags: <defaults>
</compile_context>

<pallas_src>
import functools

import numpy as np
import jax
import jax.numpy as jnp
from jax.experimental import pallas as pl
from jax.experimental.pallas import tpu as pltpu

_BN_EPS = 1e-5
_ACT_DTYPE = jnp.bfloat16          # intermediate activations / GEMM operands


def _round_up(x, m):
    return (x + m - 1) // m * m


@functools.lru_cache(maxsize=1)
def _tpu_config():
    """(vmem_limit_bytes, split_single_block_N_for_megacore)."""
    try:
        phys = int(pltpu.get_tpu_info().vmem_capacity_bytes)
    except Exception:
        phys = None
    if not phys or phys <= 0:
        return 48 * 1024 * 1024, False
    limit = max(int(phys * 3 // 4), 32 * 1024 * 1024)
    limit = min(limit, 100 * 1024 * 1024)
    # Chips with <=64 MiB VMEM per core (v7x) have two TensorCores per chip.
    split_n = phys <= 64 * 1024 * 1024
    return limit, split_n


def _choose_tile(d, cands, min_tile=1):
    """Pick a tile for one dim, preferring full-extent/divisor tiles (no pad)."""
    if d < min_tile:
        return min_tile, min_tile              # pad tiny dims up to min_tile
    if d <= cands[0]:
        return d, d                            # single full-extent block
    for t in cands:
        if d % t == 0:
            return t, d
    return cands[0], _round_up(d, cands[0])    # last resort: pad


def _pick_k(k):
    """Contraction dim: single full-extent block when it fits, else divisor tile."""
    if k <= 2048:
        return k, k                            # no rounding / zero-padding
    for t in (2048, 1024, 512, 256, 128):
        if k % t == 0:
            return t, k
    return 256, _round_up(k, 256)


# --------------------------------------------------------------------------
# Fused GEMM kernel:  out = [relu]( (A @ B) + bias [+ residual] )
#   A, B are bf16 (MXU-native), accumulation in an f32 VMEM scratch,
#   bias / residual / ReLU epilogue in f32, output cast to the out dtype.
# --------------------------------------------------------------------------
def _gemm_kernel(a_ref, b_ref, c_ref, o_ref, acc_ref, *, relu):
    @pl.when(pl.program_id(2) == 0)
    def _():
        acc_ref[...] = jnp.zeros_like(acc_ref)

    acc_ref[...] += jnp.dot(a_ref[...], b_ref[...],
                            preferred_element_type=jnp.float32)

    @pl.when(pl.program_id(2) == pl.num_programs(2) - 1)
    def _():
        y = acc_ref[...] + c_ref[...]
        if relu:
            y = jnp.maximum(y, 0.0)
        o_ref[...] = y.astype(o_ref.dtype)


def _gemm_res_kernel(a_ref, b_ref, c_ref, r_ref, o_ref, acc_ref, *, relu):
    @pl.when(pl.program_id(2) == 0)
    def _():
        acc_ref[...] = jnp.zeros_like(acc_ref)

    acc_ref[...] += jnp.dot(a_ref[...], b_ref[...],
                            preferred_element_type=jnp.float32)

    @pl.when(pl.program_id(2) == pl.num_programs(2) - 1)
    def _():
        y = acc_ref[...] + c_ref[...] + r_ref[...].astype(jnp.float32)
        if relu:
            y = jnp.maximum(y, 0.0)
        o_ref[...] = y.astype(o_ref.dtype)


def fused_matmul(a, b, bias, *, relu=False, residual=None,
                 out_dtype=jnp.float32):
    limit, split_n = _tpu_config()
    M, K = a.shape
    K2, N = b.shape
    assert K == K2, (K, K2)
    big_vmem = limit >= 90 * 1024 * 1024
    m_cands = (512, 256, 128, 64, 32, 16) if big_vmem else (256, 128, 64, 32, 16)
    min_m = 16 if np.dtype(out_dtype) == np.dtype(jnp.bfloat16) else 8
    tm, Mp = _choose_tile(M, m_cands, min_tile=min_m)
    tk, Kp = _pick_k(K)
    tn, Np = _choose_tile(N, (512, 256, 128))
    # v7x megacore only: if the (m, n) grid would collapse to a single block,
    # split N so dimension_semantics has a real parallel axis.
    if (split_n and Mp // tm == 1 and Np // tn == 1
            and tn >= 256 and (tn // 2) % 128 == 0):
        tn //= 2

    a = a.astype(_ACT_DTYPE)
    b = b.astype(_ACT_DTYPE)
    if (Mp, Kp) != (M, K):
        a = jnp.pad(a, ((0, Mp - M), (0, Kp - K)))
    if (Kp, Np) != (K, N):
        b = jnp.pad(b, ((0, Kp - K), (0, Np - N)))
    c = bias.astype(jnp.float32).reshape(1, N)
    if Np != N:
        c = jnp.pad(c, ((0, 0), (0, Np - N)))

    in_specs = [
        pl.BlockSpec((tm, tk), lambda i, j, k: (i, k)),
        pl.BlockSpec((tk, tn), lambda i, j, k: (k, j)),
        pl.BlockSpec((1, tn), lambda i, j, k: (0, j)),
    ]
    args = [a, b, c]
    if residual is not None:
        r = residual.astype(_ACT_DTYPE)
        if (Mp, Np) != (M, N):
            r = jnp.pad(r, ((0, Mp - M), (0, Np - N)))
        in_specs.append(pl.BlockSpec((tm, tn), lambda i, j, k: (i, j)))
        args.append(r)
        kernel = functools.partial(_gemm_res_kernel, relu=relu)
    else:
        kernel = functools.partial(_gemm_kernel, relu=relu)

    grid = (Mp // tm, Np // tn, Kp // tk)
    out = pl.pallas_call(
        kernel,
        out_shape=jax.ShapeDtypeStruct((Mp, Np), out_dtype),
        grid_spec=pltpu.PrefetchScalarGridSpec(
            num_scalar_prefetch=0,
            grid=grid,
            in_specs=in_specs,
            out_specs=pl.BlockSpec((tm, tn), lambda i, j, k: (i, j)),
            scratch_shapes=[pltpu.VMEM((tm, tn), jnp.float32)],
        ),
        compiler_params=pltpu.CompilerParams(
            dimension_semantics=("parallel", "parallel", "arbitrary"),
            vmem_limit_bytes=limit),
    )(*args)
    if (Mp, Np) != (M, N):
        out = out[:M, :N]
    return out


# --------------------------------------------------------------------------
# Tap-accumulating stride-1 k x k (dilated) convolution.
#   Grid: (N, output-row blocks, kh*kw taps).  The whole weight stays resident
#   in VMEM; contiguous row-slabs of the padded NHWC activation are manually
#   DMA'd (double-buffered, shared across the kw taps of one tap-row) and each
#   tap's GEMM is accumulated (with the horizontal tap shift) into an f32
#   scratch.  No im2col copy ever touches HBM.
# --------------------------------------------------------------------------
def _tapconv_kernel(w_ref, b_ref, x_hbm, o_ref, abuf, pbuf, acc, sem, *,
                    kh, kw, dil, th, wo, wp, hp, relu):
    n = pl.program_id(0)
    hb = pl.program_id(1)
    t = pl.program_id(2)
    i = t // kw
    j = t % kw
    rows = th * wp
    l0 = rows - (kw - 1) * dil          # every valid output row lives below l0

    def slab(row, slot):
        start = (n * hp + hb * th + row * dil) * wp
        return pltpu.make_async_copy(
            x_hbm.at[pl.ds(start, rows), :], abuf.at[slot], sem.at[slot])

    @pl.when(t == 0)
    def _():
        acc[...] = jnp.zeros_like(acc)
        slab(0, 0).start()

    @pl.when(j == 0)
    def _():
        slab(i, i % 2).wait()

        @pl.when(i + 1 < kh)
        def _():
            slab(i + 1, (i + 1) % 2).start()
    # TODO(synk): also prefetch the next (n, hb) block's first row-slab to hide
    # the one exposed DMA per output-row block.

    a = abuf[i % 2]                                    # (rows, Cin) bf16
    w = w_ref[t]                                       # (Cin, Cout) bf16
    pbuf[...] = jnp.dot(a, w, preferred_element_type=jnp.float32)
    # horizontal tap shift: acc[m] += P[m + j*dil]  (garbage lands past l0)
    acc[0:l0, :] = acc[0:l0, :] + pbuf[pl.ds(j * dil, l0), :]

    @pl.when(t == kh * kw - 1)
    def _():
        b = b_ref[...]                                 # (1, Cout) f32
        for r in range(th):                            # static unroll
            y = acc[r * wp:r * wp + wo, :] + b
            if relu:
                y = jnp.maximum(y, 0.0)
            o_ref[0, r, :, :] = y.astype(o_ref.dtype)


def _pick_th(ho, wo, wp, cin, cout, taps, budget):
    w_bytes = 2 * taps * cin * cout * 2
    best = 1
    for th in range(1, ho + 1):
        if ho % th:
            continue
        rows = th * wp
        need = (2 * rows * cin * 2          # A double buffer (bf16)
                + 2 * rows * cout * 4       # pbuf + acc (f32)
                + 2 * th * wo * cout * 2    # output double buffer (bf16)
                + w_bytes)
        if need > budget or th * wo > 4096:
            break
        best = th
    return best


def tap_conv2d(x, packed, *, padding, dilation, relu=True,
               out_dtype=_ACT_DTYPE):
    kh, kw = packed["kh"], packed["kw"]
    wt = packed["wt"]                       # (kh*kw, Cin, Cout) bf16
    N, H, W, Cin = x.shape
    Cout = wt.shape[-1]
    d = dilation
    Hp, Wp = H + 2 * padding, W + 2 * padding
    Ho = Hp - d * (kh - 1)
    Wo = Wp - d * (kw - 1)
    limit, _ = _tpu_config()
    th = _pick_th(Ho, Wo, Wp, Cin, Cout, kh * kw, int(limit * 0.6))
    HB = Ho // th
    rows = th * Wp

    xp = jnp.pad(x.astype(_ACT_DTYPE),
                 ((0, 0), (padding, padding), (padding, padding), (0, 0)))
    xflat = xp.reshape(N * Hp * Wp, Cin)
    bias2 = packed["b"].astype(jnp.float32).reshape(1, Cout)

    kernel = functools.partial(_tapconv_kernel, kh=kh, kw=kw, dil=d,
                               th=th, wo=Wo, wp=Wp, hp=Hp, relu=relu)
    out = pl.pallas_call(
        kernel,
        out_shape=jax.ShapeDtypeStruct((N, Ho, Wo, Cout), out_dtype),
        grid_spec=pltpu.PrefetchScalarGridSpec(
            num_scalar_prefetch=0,
            grid=(N, HB, kh * kw),
            in_specs=[
                # whole weight resident in VMEM (fetched once per call)
                pl.BlockSpec((kh * kw, Cin, Cout), lambda n, h, t: (0, 0, 0)),
                pl.BlockSpec((1, Cout), lambda n, h, t: (0, 0)),
                pl.BlockSpec(memory_space=pl.ANY),      # padded activation, HBM
            ],
            out_specs=pl.BlockSpec((1, th, Wo, Cout),
                                   lambda n, h, t: (n, h, 0, 0)),
            scratch_shapes=[
                pltpu.VMEM((2, rows, Cin), _ACT_DTYPE),   # A row-slab buffers
                pltpu.VMEM((rows, Cout), jnp.float32),    # per-tap GEMM result
                pltpu.VMEM((rows, Cout), jnp.float32),    # accumulator
                pltpu.SemaphoreType.DMA((2,)),
            ]),
        compiler_params=pltpu.CompilerParams(
            dimension_semantics=("parallel", "parallel", "arbitrary"),
            vmem_limit_bytes=limit),
    )(wt, bias2, xflat)
    return out


# --------------------------------------------------------------------------
# 3x3/stride-2 max pool (single pass, no 9x window stack in HBM).
# --------------------------------------------------------------------------
def maxpool2d(x, ksize=3, stride=2, padding=1):
    # TODO(synk): done with XLA's reduce_window (per review suggestion) rather
    # than a Pallas kernel; it is a single fused pass over the feature map.
    neg_inf = jnp.asarray(-jnp.inf, x.dtype)
    return jax.lax.reduce_window(
        x, neg_inf, jax.lax.max,
        window_dimensions=(1, ksize, ksize, 1),
        window_strides=(1, stride, stride, 1),
        padding=((0, 0), (padding, padding), (padding, padding), (0, 0)))


# --------------------------------------------------------------------------
# Global average pool (AdaptiveAvgPool2d(1)), tiled over (batch, C, H*W) with
# a reduction grid axis + f32 accumulator (VMEM-safe at any resolution).
# --------------------------------------------------------------------------
def _gap_kernel(x_ref, o_ref, acc_ref, *, denom):
    @pl.when(pl.program_id(2) == 0)
    def _():
        acc_ref[...] = jnp.zeros_like(acc_ref)

    acc_ref[...] += jnp.sum(x_ref[...].astype(jnp.float32), axis=1)

    @pl.when(pl.program_id(2) == pl.num_programs(2) - 1)
    def _():
        o_ref[...] = acc_ref[...] * (1.0 / denom)


def global_avg_pool(x):
    N, H, W, C = x.shape
    HW = H * W
    limit, _ = _tpu_config()
    xf = x.reshape(N, HW, C)
    tc, Cp = _choose_tile(C, (512, 256, 128))
    thw = min(HW, 4096)
    HWp = _round_up(HW, thw)
    if (HWp, Cp) != (HW, C):
        xf = jnp.pad(xf, ((0, 0), (0, HWp - HW), (0, Cp - C)))
    out = pl.pallas_call(
        functools.partial(_gap_kernel, denom=float(HW)),
        out_shape=jax.ShapeDtypeStruct((N, Cp), jnp.float32),
        grid_spec=pltpu.PrefetchScalarGridSpec(
            num_scalar_prefetch=0,
            grid=(N, Cp // tc, HWp // thw),
            in_specs=[pl.BlockSpec((1, thw, tc), lambda n, c, s: (n, s, c))],
            out_specs=pl.BlockSpec((1, tc), lambda n, c, s: (n, c)),
            scratch_shapes=[pltpu.VMEM((1, tc), jnp.float32)],
        ),
        compiler_params=pltpu.CompilerParams(
            dimension_semantics=("parallel", "parallel", "arbitrary"),
            vmem_limit_bytes=limit),
    )(xf)
    if Cp != C:
        out = out[:, :C]
    return out.reshape(N, 1, 1, C)


# --------------------------------------------------------------------------
# Convolution dispatch:
#   * 1x1        -> fused GEMM (optional strided pre-slice)
#   * k>1, s==1  -> tap-accumulating Pallas conv (no im2col)
#   * k>1, s>1   -> im2col fallback (only conv1 7x7/2 and two 3x3/2 convs)
# --------------------------------------------------------------------------
def _im2col(x, kh, kw, stride, padding, dilation):
    N, H, W, C = x.shape
    Ho = (H + 2 * padding - dilation * (kh - 1) - 1) // stride + 1
    Wo = (W + 2 * padding - dilation * (kw - 1) - 1) // stride + 1
    xp = jnp.pad(x, ((0, 0), (padding, padding), (padding, padding), (0, 0)))
    cols = []
    for i in range(kh):
        for j in range(kw):
            di, dj = i * dilation, j * dilation
            cols.append(xp[:, di:di + stride * (Ho - 1) + 1:stride,
                           dj:dj + stride * (Wo - 1) + 1:stride, :])
    a = jnp.concatenate(cols, axis=-1).reshape(N * Ho * Wo, kh * kw * C)
    return a, Ho, Wo
# TODO(synk): the three stride-2 convs still materialize an im2col copy; a
# phase-decomposed tap-conv would remove that last bit of extra HBM traffic.


def conv2d(x, packed, *, stride=1, padding=0, dilation=1, relu=False,
           residual=None, out_dtype=_ACT_DTYPE, keep_channels=None):
    kh, kw = packed["kh"], packed["kw"]
    c_out = packed["c_out"] if keep_channels is None else keep_channels
    N = x.shape[0]

    if kh == 1 and kw == 1 and dilation == 1 and padding == 0:
        xs = x[:, ::stride, ::stride, :] if stride != 1 else x
        _, Ho, Wo, _ = xs.shape
        a = xs.reshape(N * Ho * Wo, xs.shape[-1])
        res = (residual.reshape(N * Ho * Wo, residual.shape[-1])
               if residual is not None else None)
        wflat = packed["wt"].reshape(packed["wt"].shape[1], -1)
        out = fused_matmul(a, wflat, packed["b"], relu=relu, residual=res,
                           out_dtype=out_dtype)
        if out.shape[1] != c_out:
            out = out[:, :c_out]
        return out.reshape(N, Ho, Wo, c_out)

    if stride == 1:
        assert residual is None
        out = tap_conv2d(x, packed, padding=padding, dilation=dilation,
                         relu=relu, out_dtype=out_dtype)
        if out.shape[-1] != c_out:
            out = out[..., :c_out]
        return out

    # stride > 1 with k > 1: im2col + fused GEMM fallback
    a, Ho, Wo = _im2col(x, kh, kw, stride, padding, dilation)
    res = (residual.reshape(N * Ho * Wo, residual.shape[-1])
           if residual is not None else None)
    wflat = packed["wt"].reshape(-1, packed["wt"].shape[-1])
    out = fused_matmul(a, wflat, packed["b"], relu=relu, residual=res,
                       out_dtype=out_dtype)
    if out.shape[1] != c_out:
        out = out[:, :c_out]
    return out.reshape(N, Ho, Wo, c_out)


# --------------------------------------------------------------------------
# Bilinear resize (align_corners=False): MXU GEMM when K >= 64, otherwise a
# small-K VPU interpolation kernel.
# --------------------------------------------------------------------------
def _bilinear_matrix(in_size, out_size):
    # TODO(synk): implements align_corners=False (current F.interpolate default
    # for the deprecated F.upsample call); very old PyTorch defaulted to True.
    i = np.arange(out_size, dtype=np.float64)
    src = (i + 0.5) * (in_size / out_size) - 0.5
    src = np.maximum(src, 0.0)
    i0 = np.minimum(np.floor(src).astype(np.int64), in_size - 1)
    i1 = np.minimum(i0 + 1, in_size - 1)
    w1 = src - i0
    w0 = 1.0 - w1
    m = np.zeros((out_size, in_size), np.float32)
    m[np.arange(out_size), i0] += w0
    m[np.arange(out_size), i1] += w1
    return jnp.asarray(m)


def _interp_kernel(w_ref, x_ref, o_ref, *, k_dim):
    w = w_ref[...].astype(jnp.float32)          # (tm, K)
    x = x_ref[...].astype(jnp.float32)          # (K, tn)
    acc = w[:, 0:1] * x[0:1, :]
    for k in range(1, k_dim):
        acc = acc + w[:, k:k + 1] * x[k:k + 1, :]
    o_ref[...] = acc.astype(o_ref.dtype)


def interp_matmul(wmat, data, out_dtype=jnp.float32):
    M, K = wmat.shape
    K2, N = data.shape
    assert K == K2
    if K >= 64:
        # large source size -> run it on the MXU as a normal fused GEMM
        zero_b = jnp.zeros((N,), jnp.float32)
        return fused_matmul(wmat, data, zero_b, relu=False, out_dtype=out_dtype)
    limit, _ = _tpu_config()
    tm, Mp = _choose_tile(M, (256, 128, 64, 32, 16, 8), min_tile=8)
    tn, Np = _choose_tile(N, (512, 256, 128))
    w = wmat.astype(jnp.float32)
    d = data.astype(jnp.float32)
    if Mp != M:
        w = jnp.pad(w, ((0, Mp - M), (0, 0)))
    if Np != N:
        d = jnp.pad(d, ((0, 0), (0, Np - N)))
    out = pl.pallas_call(
        functools.partial(_interp_kernel, k_dim=K),
        out_shape=jax.ShapeDtypeStruct((Mp, Np), out_dtype),
        grid_spec=pltpu.PrefetchScalarGridSpec(
            num_scalar_prefetch=0,
            grid=(Mp // tm, Np // tn),
            in_specs=[pl.BlockSpec((tm, K), lambda i, j: (i, 0)),
                      pl.BlockSpec((K, tn), lambda i, j: (0, j))],
            out_specs=pl.BlockSpec((tm, tn), lambda i, j: (i, j)),
        ),
        compiler_params=pltpu.CompilerParams(
            dimension_semantics=("parallel", "parallel"),
            vmem_limit_bytes=limit),
    )(w, d)
    if (Mp, Np) != (M, N):
        out = out[:M, :N]
    return out


def bilinear_resize(x, out_h, out_w):
    N, H, W, C = x.shape
    if H == 1 and W == 1:
        return jnp.broadcast_to(x.astype(jnp.float32), (N, out_h, out_w, C))
    wh = _bilinear_matrix(H, out_h)
    ww = _bilinear_matrix(W, out_w)
    xt = jnp.transpose(x, (1, 0, 2, 3)).reshape(H, N * W * C)
    y = interp_matmul(wh, xt, out_dtype=_ACT_DTYPE).reshape(out_h, N, W, C)
    yt = jnp.transpose(y, (2, 1, 0, 3)).reshape(W, N * out_h * C)
    z = interp_matmul(ww, yt, out_dtype=jnp.float32).reshape(out_w, N, out_h, C)
    return jnp.transpose(z, (1, 2, 0, 3))


# --------------------------------------------------------------------------
# Deterministic parameter initialization + one-time weight prepacking
# --------------------------------------------------------------------------
class _KeyGen:
    def __init__(self, seed):
        self._key = jax.random.PRNGKey(seed)

    def __call__(self):
        self._key, sub = jax.random.split(self._key)
        return sub


def _he_conv(kg, c_out, c_in, kh, kw):
    fan_in = c_in * kh * kw
    return (jax.random.normal(kg(), (c_out, c_in, kh, kw), jnp.float32)
            * np.sqrt(2.0 / fan_in))


def _pack(w, b=None, bn=True, pad_cout_to=None):
    """Prepack a conv weight into a (kh*kw, Cin, Cout) bf16 tensor, BN folded."""
    c_out, c_in, kh, kw = w.shape
    wt = jnp.transpose(w, (2, 3, 1, 0)).reshape(kh * kw, c_in, c_out)
    wt = wt.astype(jnp.float32)
    bias = b if b is not None else jnp.zeros((c_out,), jnp.float32)
    if bn:
        # TODO(synk): BatchNorm folded with eval-mode PyTorch-default statistics
        # (gamma=1, beta=0, running_mean=0, running_var=1); real running stats
        # would be folded into the same scale/bias.
        s = 1.0 / np.sqrt(1.0 + _BN_EPS)
        wt = wt * s
        bias = bias * s
    if pad_cout_to is not None and c_out < pad_cout_to:
        wt = jnp.pad(wt, ((0, 0), (0, 0), (0, pad_cout_to - c_out)))
        bias = jnp.pad(bias, (0, pad_cout_to - c_out))
    return {"wt": wt.astype(_ACT_DTYPE), "b": bias.astype(jnp.float32),
            "kh": kh, "kw": kw, "c_out": c_out}


def _conv_wb(kg, c_out, c_in, k, bn=True, pad_cout_to=None):
    w = _he_conv(kg, c_out, c_in, k, k)
    bound = 1.0 / np.sqrt(c_in * k * k)
    b = jax.random.uniform(kg(), (c_out,), jnp.float32, -bound, bound)
    return _pack(w, b, bn=bn, pad_cout_to=pad_cout_to)


def _bottleneck_params(kg, in_ch, channels, stride, dilation):
    out_ch = 4 * channels
    p = {
        "conv1": _pack(_he_conv(kg, channels, in_ch, 1, 1)),
        "conv2": _pack(_he_conv(kg, channels, channels, 3, 3)),
        "conv3": _pack(_he_conv(kg, out_ch, channels, 1, 1)),
        "stride": stride,
        "dilation": dilation,
    }
    if stride != 1 or in_ch != out_ch:
        p["downsample"] = _pack(_he_conv(kg, out_ch, in_ch, 1, 1))
    return p


def _make_layer_params(kg, in_ch, channels, num_blocks, stride, dilation=1):
    blocks = []
    for s in [stride] + [1] * (num_blocks - 1):
        blocks.append(_bottleneck_params(kg, in_ch, channels, s, dilation))
        in_ch = 4 * channels
    return blocks


def init_deeplab_params(seed=0, n_channels=3, n_classes=3):
    kg = _KeyGen(seed)
    resnet = {
        "conv1": _pack(_he_conv(kg, 64, n_channels, 7, 7)),        # 7x7 /2
        "layer1": _make_layer_params(kg, 64, 64, 3, stride=1),
        "layer2": _make_layer_params(kg, 256, 128, 4, stride=2),
        "layer3": _make_layer_params(kg, 512, 256, 6, stride=2),
        # ResNet50_OS16: dilated residual layer (stride 1, dilation 2)
        "layer5": _make_layer_params(kg, 1024, 512, 3, stride=1, dilation=2),
    }
    aspp = {
        "conv_1x1_1": _conv_wb(kg, 256, 2048, 1),
        "conv_3x3_1": _conv_wb(kg, 256, 2048, 3),
        "conv_3x3_2": _conv_wb(kg, 256, 2048, 3),
        "conv_3x3_3": _conv_wb(kg, 256, 2048, 3),
        "conv_1x1_2": _conv_wb(kg, 256, 2048, 1),
        "conv_1x1_3": _conv_wb(kg, 256, 1280, 1),
        # classifier: keep the lane dim 128-wide inside the kernel; slice to
        # n_classes outside the kernel.
        "conv_1x1_4": _conv_wb(kg, n_classes, 256, 1, bn=False, pad_cout_to=128),
    }
    return {"resnet": resnet, "aspp": aspp, "n_classes": n_classes}


# --------------------------------------------------------------------------
# Forward pass
# --------------------------------------------------------------------------
def _bottleneck_forward(x, p):
    out = conv2d(x, p["conv1"], relu=True)
    out = conv2d(out, p["conv2"], stride=p["stride"], padding=p["dilation"],
                 dilation=p["dilation"], relu=True)
    if "downsample" in p:
        identity = conv2d(x, p["downsample"], stride=p["stride"], relu=False)
    else:
        identity = x
    # conv3 + BN + residual add + ReLU fused into a single GEMM epilogue.
    return conv2d(out, p["conv3"], relu=True, residual=identity)


def _resnet_forward(x, p):
    x = conv2d(x, p["conv1"], stride=2, padding=3, relu=True)
    x = maxpool2d(x, ksize=3, stride=2, padding=1)
    for name in ("layer1", "layer2", "layer3", "layer5"):
        for blk in p[name]:
            x = _bottleneck_forward(x, blk)
    return x  # (N, H/16, W/16, 2048) bf16


def _aspp_forward(fm, p, n_classes):
    N, H, W, _ = fm.shape
    out_1x1 = conv2d(fm, p["conv_1x1_1"], relu=True)
    out_3x3_1 = conv2d(fm, p["conv_3x3_1"], padding=6, dilation=6, relu=True)
    out_3x3_2 = conv2d(fm, p["conv_3x3_2"], padding=12, dilation=12, relu=True)
    out_3x3_3 = conv2d(fm, p["conv_3x3_3"], padding=18, dilation=18, relu=True)
    out_img = global_avg_pool(fm)                               # (N,1,1,2048) f32
    out_img = conv2d(out_img, p["conv_1x1_2"], relu=True)       # (N,1,1,256) bf16
    # Bilinear resize of a 1x1 map is a pure broadcast (no GEMM needed).
    out_img = jnp.broadcast_to(out_img, (N, H, W, out_img.shape[-1]))
    out = jnp.concatenate([out_1x1, out_3x3_1, out_3x3_2, out_3x3_3, out_img],
                          axis=-1)
    out = conv2d(out, p["conv_1x1_3"], relu=True)
    # Keep a lane-friendlier channel count (>= 4, extra channels are exact
    # zeros from the padded classifier weights) through the upsample.
    keep = max(4, n_classes)
    out = conv2d(out, p["conv_1x1_4"], relu=False, out_dtype=jnp.float32,
                 keep_channels=keep)
    return out                                                  # (N,H,W,keep) f32


def deeplabv3_forward(x_nchw, params):
    """x: (N, C, H, W) float32 (PyTorch NCHW); returns (N, n_classes, H, W)."""
    h, w = x_nchw.shape[2], x_nchw.shape[3]
    n_classes = params["n_classes"]
    x = jnp.transpose(x_nchw, (0, 2, 3, 1)).astype(_ACT_DTYPE)
    fm = _resnet_forward(x, params["resnet"])
    out = _aspp_forward(fm, params["aspp"], n_classes)
    out = bilinear_resize(out, h, w)      # F.upsample(..., mode='bilinear')
    out = out[..., :n_classes]
    return jnp.transpose(out, (0, 3, 1, 2))


if __name__ == "__main__":
    key = jax.random.PRNGKey(0)
    x = jax.random.normal(key, (2, 3, 32, 32), jnp.float32)   # NCHW like PyTorch
    params = init_deeplab_params(seed=0, n_channels=3, n_classes=3)
    out = deeplabv3_forward(x, params)
    out = jax.block_until_ready(out)
    assert out.shape == (2, 3, 32, 32), out.shape
    assert bool(jnp.all(jnp.isfinite(out)))
    print("KERNEL_OK")
</pallas_src>

<mosaic_0001>
module attributes {stable_mosaic.version = 11 : i64} {
  func.func @_gemm_kernel(%arg0: i32, %arg1: i32, %arg2: i32, %arg3: memref<256x147xbf16, #tpu.memory_space<vmem>>, %arg4: memref<147x64xbf16, #tpu.memory_space<vmem>>, %arg5: memref<1x64xf32, #tpu.memory_space<vmem>>, %arg6: memref<256x64xbf16, #tpu.memory_space<vmem>>, %arg7: memref<256x64xf32, #tpu.memory_space<vmem>>) attributes {dimension_semantics = [#tpu.dimension_semantics<parallel>, #tpu.dimension_semantics<parallel>, #tpu.dimension_semantics<arbitrary>], iteration_bounds = array<i64: 2, 1, 1>, scalar_prefetch = 0 : i64, scratch_operands = 1 : i64, tpu.core_type = #tpu.core_type<tc>, window_params = [{transform_indices = @transform_0, window_bounds = array<i64: 256, 147>}, {transform_indices = @transform_1, window_bounds = array<i64: 147, 64>}, {transform_indices = @transform_2, window_bounds = array<i64: 1, 64>}, {transform_indices = @transform_3, window_bounds = array<i64: 256, 64>}]} {
    %c0_i32 = arith.constant 0 : i32
    %0 = arith.cmpi eq, %arg2, %c0_i32 : i32
    %1 = arith.extui %0 : i1 to i32
    %c0_i32_0 = arith.constant 0 : i32
    %2 = arith.cmpi ne, %1, %c0_i32_0 : i32
    scf.if %2 {
      %cst_10 = arith.constant 0.000000e+00 : f32
      %12 = vector.broadcast %cst_10 : f32 to vector<256x64xf32>
      %c0_11 = arith.constant 0 : index
      %c0_12 = arith.constant 0 : index
      %13 = vector.load %arg7[%c0_11, %c0_12] : memref<256x64xf32, #tpu.memory_space<vmem>>, vector<256x64xf32>
      tpu.vector_store %arg7[%c0_11, %c0_12], %12 {strides = array<i32>} : memref<256x64xf32, #tpu.memory_space<vmem>>, vector<256x64xf32>,
    } else {
    }
    %c0 = arith.constant 0 : index
    %c0_1 = arith.constant 0 : index
    %3 = vector.load %arg7[%c0, %c0_1] : memref<256x64xf32, #tpu.memory_space<vmem>>, vector<256x64xf32>
    %c0_2 = arith.constant 0 : index
    %c0_3 = arith.constant 0 : index
    %4 = vector.load %arg3[%c0_2, %c0_3] : memref<256x147xbf16, #tpu.memory_space<vmem>>, vector<256x147xbf16>
    %c0_4 = arith.constant 0 : index
    %c0_5 = arith.constant 0 : index
    %5 = vector.load %arg4[%c0_4, %c0_5] : memref<147x64xbf16, #tpu.memory_space<vmem>>, vector<147x64xbf16>
    %cst = arith.constant dense<0.000000e+00> : vector<256x64xf32>
    %6 = tpu.matmul %4, %5, %cst {dimension_numbers = #tpu.dot_dimension_numbers<[1], [0], [0], [1], [0, 0, 1, 1], [], []>} : vector<256x147xbf16>, vector<147x64xbf16>, vector<256x64xf32> -> vector<256x64xf32>
    %7 = arith.addf %3, %6 : vector<256x64xf32>
    %c0_6 = arith.constant 0 : index
    %c0_7 = arith.constant 0 : index
    %8 = vector.load %arg7[%c0_6, %c0_7] : memref<256x64xf32, #tpu.memory_space<vmem>>, vector<256x64xf32>
    tpu.vector_store %arg7[%c0_6, %c0_7], %7 {strides = array<i32>} : memref<256x64xf32, #tpu.memory_space<vmem>>, vector<256x64xf32>,
    %c0_i32_8 = arith.constant 0 : i32
    %9 = arith.cmpi eq, %arg2, %c0_i32_8 : i32
    %10 = arith.extui %9 : i1 to i32
    %c0_i32_9 = arith.constant 0 : i32
    %11 = arith.cmpi ne, %10, %c0_i32_9 : i32
    scf.if %11 {
      %c0_10 = arith.constant 0 : index
      %c0_11 = arith.constant 0 : index
      %12 = vector.load %arg7[%c0_10, %c0_11] : memref<256x64xf32, #tpu.memory_space<vmem>>, vector<256x64xf32>
      %c0_12 = arith.constant 0 : index
      %c0_13 = arith.constant 0 : index
      %13 = vector.load %arg5[%c0_12, %c0_13] : memref<1x64xf32, #tpu.memory_space<vmem>>, vector<1x64xf32>
      %14 = vector.broadcast %13 : vector<1x64xf32> to vector<256x64xf32>
      %15 = arith.addf %12, %14 : vector<256x64xf32>
      %cst_14 = arith.constant 0.000000e+00 : f32
      %16 = vector.broadcast %cst_14 : f32 to vector<256x64xf32>
      %17 = arith.maximumf %15, %16 : vector<256x64xf32>
      %18 = arith.truncf %17 : vector<256x64xf32> to vector<256x64xbf16>
      %c0_15 = arith.constant 0 : index
      %c0_16 = arith.constant 0 : index
      %19 = vector.load %arg6[%c0_15, %c0_16] : memref<256x64xbf16, #tpu.memory_space<vmem>>, vector<256x64xbf16>
      tpu.vector_store %arg6[%c0_15, %c0_16], %18 {strides = array<i32>} : memref<256x64xbf16, #tpu.memory_space<vmem>>, vector<256x64xbf16>,
    } else {
    }
    return
  }
  func.func @transform_0(%arg0: i32, %arg1: i32, %arg2: i32) -> (i32, i32) {
    %c0_i32 = arith.constant 0 : i32
    return %arg0, %arg2 : i32, i32
  }
  func.func @transform_1(%arg0: i32, %arg1: i32, %arg2: i32) -> (i32, i32) {
    %c0_i32 = arith.constant 0 : i32
    return %arg2, %arg1 : i32, i32
  }
  func.func @transform_2(%arg0: i32, %arg1: i32, %arg2: i32) -> (i32, i32) {
    %c0_i32 = arith.constant 0 : i32
    %c0_i32_0 = arith.constant 0 : i32
    return %c0_i32, %arg1 : i32, i32
  }
  func.func @transform_3(%arg0: i32, %arg1: i32, %arg2: i32) -> (i32, i32) {
    %c0_i32 = arith.constant 0 : i32
    return %arg0, %arg1 : i32, i32
  }
}

</mosaic_0001>

<bundles_post_ra>
// kernel: tpu_custom_call.1
= control target key start
LH: loop header
LB: loop body
LE: loop exit
PB: predicated region body
PF: predicated region fallthrough
CT: control target
= control target key end

     0   :  { %s1542_s12 = smov 0   ;;  %s1544_s13 = smov 0   ;;  %s1848_s0 = inlined_call_operand.vmem [shape: bf16[512,147], index: 0, kind: input, shape index: {}]   ;;  %s1849_s1 = inlined_call_operand.vmem [shape: bf16[147,64], index: 1, kind: input, shape index: {}]   ;;  %s1850_s2 = inlined_call_operand.vmem [shape: f32[1,64], index: 2, kind: input, shape index: {}]   ;;  %s1851_s3 = inlined_call_operand.vmem [shape: bf16[512,64], index: 3, kind: output, shape index: {}]  }
   0x1   :  { %s1546_s14 = smov 0  }
   0x2 LB: > { %s32_s15 = sadd.s32 1, %s1513_s13  ;;  %p1258_p0 = scmp.ge.s32.totalorder %s1517_s14, 1  ;;  %s1517_s14 = sphi %s1546_s14, %s13_s14   ;;  %s1513_s13 = sphi %s1544_s13, %s1853_s13   ;;  %s1509_s12 = sphi %s1542_s12, %s1852_s12  }
   0x3   : > { %p34_p1 = scmp.ge.s32.totalorder %s32_s15, 2  ;;  %p191_p2 = scmp.lt.s32.totalorder %s1517_s14, 3 }
   0x5   : > { %s1855_s15 = smov (%p34_p1, %s32_s15), 0  ;;  %p192_p3 = pnand %p1258_p0, %p191_p2 }
   0x6   : > { %s1259_s22 = sshll.u32 (!%p192_p3), %s1509_s12, 5 }
   0x7   : > { %195 = sbr.rel (%p192_p3) target bundleno = 324 (0x144), region = 32  ;;  %p236_p4 = scmp.lt.s32.totalorder (!%p192_p3), %s1259_s22, 63 }
   0xc   : > { %v1437_v0 = vld [vmem:[%s1849_s1 + $0x38] sm:$0xff]   ;;  %v1519_v1 = vmov 0   ;;  %v1438_v2 = vld [vmem:[%s1849_s1 + $0x30] sm:$0xff]   ;;  %v1439_v3 = vld [vmem:[%s1849_s1 + $0x28] sm:$0xff]   ;;  %s1857_s22 = smov (!%p236_p4, %s1259_s22), 63  ;;  %vm272_vm0 = vcmask 523264  }
   0xd   : > { %645 = vmatprep.subr.bf16.mxu0 %v1519_v1  ;;  %1390 = vmatprep.subr.bf16.mxu1 %v1519_v1  ;;  %v1440_v4 = vld [vmem:[%s1849_s1 + $0x20] sm:$0xff]   ;;  %s1357_s25 = sshll.u32 %s1857_s22, 3  ;;  %v1520_v5 = vmov 0.0   ;;  %v1441_v6 = vld [vmem:[%s1849_s1 + $0x18] sm:$0xff]   ;;  %vm589_vm1 = vcmask 154624   ;;  %v1442_v9 = vld [vmem:[%s1849_s1 + $0x10] sm:$0xff]  }
   0xe   : > { %646 = vmatpush1.bf16.msra.mxu0 %v1437_v0  ;;  %1400 = vmatpush1.bf16.msra.mxu1 %v1437_v0  ;;  %273 = vst.msk [vmem:[#allocation2] sm:$0xff] %vm272_vm0, %v1520_v5  ;;  %274 = vst.msk [vmem:[#allocation2 + $0x8] sm:$0xff] %vm272_vm0, %v1520_v5  ;;  %s1620_s28 = scalar_lea.vmem %s1848_s0, %s1357_s25  ;;  %vm638_vm2 = vcmask 1040384   ;;  %v1443_v10 = vld [vmem:[%s1849_s1 + $0x8] sm:$0xff]   ;;  %vm639_vm3 = vcmask 1041408   ;;  %v1521_v11 = vmov 65535  }
   0xf   : > { %647 = vmatprep.subr.bf16.mxu0 %v1519_v1  ;;  %1391 = vmatprep.subr.bf16.mxu1 %v1519_v1  ;;  %275 = vst.msk [vmem:[#allocation2 + $0x10] sm:$0xff] %vm272_vm0, %v1520_v5  ;;  %276 = vst.msk [vmem:[#allocation2 + $0x18] sm:$0xff] %vm272_vm0, %v1520_v5  ;;  %v1449_v7 = vld [vmem:[%s1620_s28 + $0x4] ss:$8 sps:$4 sm:$0xff]   ;;  %v640_v12 = vsel %vm638_vm2, 4294967295, %v1521_v11  ;;  %s1263_s19 = sshll.u32 %s1857_s22, 2 }
  0x10   : > { %277 = vst.msk [vmem:[#allocation2 + $0x20] sm:$0xff] %vm272_vm0, %v1520_v5  ;;  %278 = vst.msk [vmem:[#allocation2 + $0x28] sm:$0xff] %vm272_vm0, %v1520_v5  ;;  %v1452_v8 = vld [vmem:[%s1620_s28 + $0x84] ss:$8 sps:$4 sm:$0xff]   ;;  %1306 = vmatprep.mubr.msk.bf16.mxu0 %vm589_vm1, %v1449_v7  ;;  %v641_v15 = vsel %vm639_vm3, %v640_v12, 0  ;;  %s1717_s23 = scalar_lea.vmem %s1851_s3, %s1263_s19  ;;  %vm1105_vm4 = vcmask 519168  }
  0x11   : > { %279 = vst.msk [vmem:[#allocation2 + $0x30] sm:$0xff] %vm272_vm0, %v1520_v5  ;;  %280 = vst.msk [vmem:[#allocation2 + $0x38] sm:$0xff] %vm272_vm0, %v1520_v5  ;;  %1314 = vmatprep.mubr.msk.bf16.mxu1 %vm589_vm1, %v1452_v8  ;;  %v1444_v13 = vld [vmem:[%s1849_s1] sm:$0xff]   ;;  %v1445_v14 = vld [vmem:[%s1849_s1 + $0x48] ss:$0 sps:$4 sm:$0x33]  }
  0x12   : > { %648 = vmatpush1.bf16.msra.mxu0 %v1438_v2  ;;  %1401 = vmatpush1.bf16.msra.mxu1 %v1438_v2  ;;  %281 = vst.msk [vmem:[#allocation2 + $0x40] sm:$0xff] %vm272_vm0, %v1520_v5  ;;  %282 = vst.msk [vmem:[#allocation2 + $0x48] sm:$0xff] %vm272_vm0, %v1520_v5  ;;  %v643_v16 = vand.u32 %v1445_v14, %v641_v15  ;;  %v1446_v17 = vld [vmem:[%s1849_s1 + $0x40] sm:$0xff]   ;;  %v1453_v20 = vld [vmem:[%s1620_s28 + $0x14] ss:$8 sps:$4 sm:$0xff]  }
  0x13   : > { %649 = vmatprep.subr.bf16.mxu0 %v1519_v1  ;;  %1392 = vmatprep.subr.bf16.mxu1 %v1519_v1  ;;  %283 = vst.msk [vmem:[#allocation2 + $0x50] sm:$0xff] %vm272_vm0, %v1520_v5  ;;  %284 = vst.msk [vmem:[#allocation2 + $0x58] sm:$0xff] %vm272_vm0, %v1520_v5  ;;  %v1447_v18 = vld [vmem:[%s1620_s28] ss:$8 sps:$4 sm:$0xff]   ;;  %v1455_v21 = vld [vmem:[%s1620_s28 + $0x94] ss:$8 sps:$4 sm:$0xff]  }
  0x14   : > { %285 = vst.msk [vmem:[#allocation2 + $0x60] sm:$0xff] %vm272_vm0, %v1520_v5  ;;  %286 = vst.msk [vmem:[#allocation2 + $0x68] sm:$0xff] %vm272_vm0, %v1520_v5  ;;  %v1450_v19 = vld [vmem:[%s1620_s28 + $0x80] ss:$8 sps:$4 sm:$0xff]   ;;  %v1457_v22 = vld [vmem:[%s1620_s28 + $0x10] ss:$8 sps:$4 sm:$0xff]  }
  0x15   : > { %287 = vst.msk [vmem:[#allocation2 + $0x70] sm:$0xff] %vm272_vm0, %v1520_v5  ;;  %288 = vst.msk [vmem:[#allocation2 + $0x78] sm:$0xff] %vm272_vm0, %v1520_v5  ;;  %v1458_v23 = vld [vmem:[%s1620_s28 + $0x90] ss:$8 sps:$4 sm:$0xff]   ;;  %v1459_v24 = vld [vmem:[%s1620_s28 + $0x24] ss:$8 sps:$4 sm:$0xff]  }
  0x16   : > { %650 = vmatpush1.bf16.msra.mxu0 %v1439_v3  ;;  %1402 = vmatpush1.bf16.msra.mxu1 %v1439_v3  ;;  %289 = vst.msk [vmem:[#allocation2 + $0x80] sm:$0xff] %vm272_vm0, %v1520_v5  ;;  %290 = vst.msk [vmem:[#allocation2 + $0x88] sm:$0xff] %vm272_vm0, %v1520_v5  ;;  %v1461_v25 = vld [vmem:[%s1620_s28 + $0xa4] ss:$8 sps:$4 sm:$0xff]   ;;  %v1463_v26 = vld [vmem:[%s1620_s28 + $0x20] ss:$8 sps:$4 sm:$0xff]  }
  0x17   : > { %651 = vmatprep.subr.bf16.mxu0 %v1519_v1  ;;  %1393 = vmatprep.subr.bf16.mxu1 %v1519_v1  ;;  %291 = vst.msk [vmem:[#allocation2 + $0x90] sm:$0xff] %vm272_vm0, %v1520_v5  ;;  %292 = vst.msk [vmem:[#allocation2 + $0x98] sm:$0xff] %vm272_vm0, %v1520_v5  ;;  %v1464_v27 = vld [vmem:[%s1620_s28 + $0xa0] ss:$8 sps:$4 sm:$0xff]   ;;  %v1465_v28 = vld [vmem:[%s1620_s28 + $0x34] ss:$8 sps:$4 sm:$0xff]  }
  0x18   : > { %293 = vst.msk [vmem:[#allocation2 + $0xa0] sm:$0xff] %vm272_vm0, %v1520_v5  ;;  %294 = vst.msk [vmem:[#allocation2 + $0xa8] sm:$0xff] %vm272_vm0, %v1520_v5  ;;  %v1467_v29 = vld [vmem:[%s1620_s28 + $0xb4] ss:$8 sps:$4 sm:$0xff]   ;;  %v1469_v30 = vld [vmem:[%s1620_s28 + $0x30] ss:$8 sps:$4 sm:$0xff]  }
  0x19   : > { %295 = vst.msk [vmem:[#allocation2 + $0xb0] sm:$0xff] %vm272_vm0, %v1520_v5  ;;  %296 = vst.msk [vmem:[#allocation2 + $0xb8] sm:$0xff] %vm272_vm0, %v1520_v5  ;;  %v1470_v31 = vld [vmem:[%s1620_s28 + $0xb0] ss:$8 sps:$4 sm:$0xff]   ;;  %v1471_v32 = vld [vmem:[%s1620_s28 + $0x44] ss:$8 sps:$4 sm:$0xff]  }
  0x1a   : > { %297 = vst.msk [vmem:[#allocation2 + $0xc0] sm:$0xff] %vm272_vm0, %v1520_v5  ;;  %298 = vst.msk [vmem:[#allocation2 + $0xc8] sm:$0xff] %vm272_vm0, %v1520_v5  ;;  %652 = vmatpush1.bf16.msra.mxu0 %v1440_v4  ;;  %1403 = vmatpush1.bf16.msra.mxu1 %v1440_v4  ;;  %v1473_v33 = vld [vmem:[%s1620_s28 + $0xc4] ss:$8 sps:$4 sm:$0xff]   ;;  %v1475_v34 = vld [vmem:[%s1620_s28 + $0x40] ss:$8 sps:$4 sm:$0xff]  }
  0x1b   : > { %299 = vst.msk [vmem:[#allocation2 + $0xd0] sm:$0xff] %vm272_vm0, %v1520_v5  ;;  %300 = vst.msk [vmem:[#allocation2 + $0xd8] sm:$0xff] %vm272_vm0, %v1520_v5  ;;  %653 = vmatprep.subr.bf16.mxu0 %v1519_v1  ;;  %1394 = vmatprep.subr.bf16.mxu1 %v1519_v1  ;;  %v1476_v35 = vld [vmem:[%s1620_s28 + $0xc0] ss:$8 sps:$4 sm:$0xff]   ;;  %v1477_v36 = vld [vmem:[%s1620_s28 + $0x54] ss:$8 sps:$4 sm:$0xff]  }
  0x1c   : > { %301 = vst.msk [vmem:[#allocation2 + $0xe0] sm:$0xff] %vm272_vm0, %v1520_v5  ;;  %302 = vst.msk [vmem:[#allocation2 + $0xe8] sm:$0xff] %vm272_vm0, %v1520_v5  ;;  %v1479_v37 = vld [vmem:[%s1620_s28 + $0xd4] ss:$8 sps:$4 sm:$0xff]   ;;  %v1481_v38 = vld [vmem:[%s1620_s28 + $0x50] ss:$8 sps:$4 sm:$0xff]  }
  0x1d   : > { %303 = vst.msk [vmem:[#allocation2 + $0xf0] sm:$0xff] %vm272_vm0, %v1520_v5  ;;  %304 = vst.msk [vmem:[#allocation2 + $0xf8] sm:$0xff] %vm272_vm0, %v1520_v5  ;;  %v1482_v39 = vld [vmem:[%s1620_s28 + $0xd0] ss:$8 sps:$4 sm:$0xff]   ;;  %v1483_v40 = vld [vmem:[%s1620_s28 + $0x64] ss:$8 sps:$4 sm:$0xff]  }
  0x1e   : > { %654 = vmatpush1.bf16.msra.mxu0 %v1441_v6  ;;  %1404 = vmatpush1.bf16.msra.mxu1 %v1441_v6  ;;  %v1485_v41 = vld [vmem:[%s1620_s28 + $0xe4] ss:$8 sps:$4 sm:$0xff]   ;;  %v1487_v42 = vld [vmem:[%s1620_s28 + $0x60] ss:$8 sps:$4 sm:$0xff]   ;;  %v1489_v44 = vld [vmem:[%s1620_s28 + $0x74] ss:$8 sps:$4 sm:$0xff]  }
  0x1f   : > { %655 = vmatprep.subr.bf16.mxu0 %v1519_v1  ;;  %1395 = vmatprep.subr.bf16.mxu1 %v1519_v1  ;;  %v1488_v43 = vld [vmem:[%s1620_s28 + $0xe0] ss:$8 sps:$4 sm:$0xff]   ;;  %v1491_v45 = vld [vmem:[%s1620_s28 + $0xf4] ss:$8 sps:$4 sm:$0xff]   ;;  %v1493_v46 = vld [vmem:[%s1620_s28 + $0x70] ss:$8 sps:$4 sm:$0xff]  }
  0x20   : > { %v1494_v47 = vld [vmem:[%s1620_s28 + $0xf0] ss:$8 sps:$4 sm:$0xff]   ;;  %v305_v48 = vld [vmem:[#allocation2] sm:$0xff]  ;;  %v306_v56 = vld [vmem:[#allocation2 + $0x8] sm:$0xff] }
  0x21   : > { %v321_v49 = vld [vmem:[#allocation2 + $0x80] sm:$0xff]  ;;  %v322_v57 = vld [vmem:[#allocation2 + $0x88] sm:$0xff]  ;;  %v307_v0 = vld [vmem:[#allocation2 + $0x10] sm:$0xff] }
  0x22   : > { %656 = vmatpush1.bf16.msra.mxu0 %v1442_v9  ;;  %1405 = vmatpush1.bf16.msra.mxu1 %v1442_v9  ;;  %v1707_v2 = vld [vmem:[%s1850_s2] ss:$0 sm:$0xff]  ;;  %v308_v7 = vld [vmem:[#allocation2 + $0x18] sm:$0xff] }
  0x23   : > { %657 = vmatprep.subr.bf16.mxu0 %v1519_v1  ;;  %1396 = vmatprep.subr.bf16.mxu1 %v1519_v1  ;;  %v324_v12 = vld [vmem:[#allocation2 + $0x98] sm:$0xff] }
  0x26   : > { %658 = vmatpush1.bf16.msra.mxu0 %v1443_v10  ;;  %1406 = vmatpush1.bf16.msra.mxu1 %v1443_v10 }
  0x27   : > { %659 = vmatprep.subr.bf16.mxu0 %v1519_v1  ;;  %1397 = vmatprep.subr.bf16.mxu1 %v1519_v1 }
  0x2a   : > { %660 = vmatpush1.bf16.msra.mxu0 %v1444_v13  ;;  %1407 = vmatpush1.bf16.msra.mxu1 %v1444_v13 }
  0x2b   : > { %673 = vmatprep.subr.bf16.mxu0 %v1519_v1  ;;  %1398 = vmatprep.subr.bf16.mxu1 %v1519_v1 }
  0x2e   : > { %674 = vmatpush2.bf16.msra.mxu0 %v643_v16  ;;  %1408 = vmatpush2.bf16.msra.mxu1 %v643_v16 }
  0x2f   : > { %675 = vmatprep.subr.bf16.mxu0 %v1519_v1  ;;  %1399 = vmatprep.subr.bf16.mxu1 %v1519_v1  ;;  %v323_v1 = vld [vmem:[#allocation2 + $0x90] sm:$0xff] }
  0x32   : > { %676 = vmatpush2.bf16.msra.mxu0 %v1446_v17  ;;  %1409 = vmatpush2.bf16.msra.mxu1 %v1446_v17 }
  0x35   : > { %678 = vmatmul.mubr.bf16.vlgmr.msra.gmra.mxu0 %v1447_v18  ;;  %742 = vmatmul.mubr.bf16.vlgmr.msra.gmra.mxu1 %v1450_v19 }
  0x36   : > { %1307 = vmatprep.mubr.msk.bf16.mxu0 %vm589_vm1, %v1453_v20  ;;  %1315 = vmatprep.mubr.msk.bf16.mxu1 %vm589_vm1, %v1455_v21  ;;  %v309_v21 = vld [vmem:[#allocation2 + $0x20] sm:$0xff] }
  0x3d   : > { %686 = vmatmul.mubr.bf16.gmra.mxu0 %v1457_v22  ;;  %750 = vmatmul.mubr.bf16.gmra.mxu1 %v1458_v23 }
  0x3e   : > { %1308 = vmatprep.mubr.msk.bf16.mxu0 %vm589_vm1, %v1459_v24  ;;  %1316 = vmatprep.mubr.msk.bf16.mxu1 %vm589_vm1, %v1461_v25 }
  0x45   : > { %694 = vmatmul.mubr.bf16.gmra.mxu0 %v1463_v26  ;;  %758 = vmatmul.mubr.bf16.gmra.mxu1 %v1464_v27  ;;  %v325_v26 = vld [vmem:[#allocation2 + $0xa0] sm:$0xff] }
  0x46   : > { %1309 = vmatprep.mubr.msk.bf16.mxu0 %vm589_vm1, %v1465_v28  ;;  %1317 = vmatprep.mubr.msk.bf16.mxu1 %vm589_vm1, %v1467_v29 }
  0x4d   : > { %702 = vmatmul.mubr.bf16.gmra.mxu0 %v1469_v30  ;;  %766 = vmatmul.mubr.bf16.gmra.mxu1 %v1470_v31 }
  0x4e   : > { %1310 = vmatprep.mubr.msk.bf16.mxu0 %vm589_vm1, %v1471_v32  ;;  %1318 = vmatprep.mubr.msk.bf16.mxu1 %vm589_vm1, %v1473_v33 }
  0x55   : > { %710 = vmatmul.mubr.bf16.gmra.mxu0 %v1475_v34  ;;  %774 = vmatmul.mubr.bf16.gmra.mxu1 %v1476_v35 }
  0x56   : > { %1311 = vmatprep.mubr.msk.bf16.mxu0 %vm589_vm1, %v1477_v36  ;;  %1319 = vmatprep.mubr.msk.bf16.mxu1 %vm589_vm1, %v1479_v37  ;;  %v310_v37 = vld [vmem:[#allocation2 + $0x28] sm:$0xff] }
  0x5d   : > { %718 = vmatmul.mubr.bf16.gmra.mxu0 %v1481_v38  ;;  %782 = vmatmul.mubr.bf16.gmra.mxu1 %v1482_v39 }
  0x5e   : > { %1312 = vmatprep.mubr.msk.bf16.mxu0 %vm589_vm1, %v1483_v40  ;;  %1320 = vmatprep.mubr.msk.bf16.mxu1 %vm589_vm1, %v1485_v41 }
  0x65   : > { %726 = vmatmul.mubr.bf16.gmra.mxu0 %v1487_v42  ;;  %790 = vmatmul.mubr.bf16.gmra.mxu1 %v1488_v43  ;;  %v326_v42 = vld [vmem:[#allocation2 + $0xa8] sm:$0xff] }
  0x66   : > { %1313 = vmatprep.mubr.msk.bf16.mxu0 %vm589_vm1, %v1489_v44  ;;  %1321 = vmatprep.mubr.msk.bf16.mxu1 %vm589_vm1, %v1491_v45 }
  0x6d   : > { %734 = vmatmul.mubr.bf16.gmra.mxu0 %v1493_v46  ;;  %798 = vmatmul.mubr.bf16.gmra.mxu1 %v1494_v47 }
  0xf5   : > { %v679_v50 = vpop.f32.mrf.mxu0  ;;  %v743_v51 = vpop.f32.mrf.mxu1 }
  0xf6   : > { %v806_v52 = vadd.f32 %v679_v50, %v305_v48  ;;  %v822_v53 = vadd.f32 %v743_v51, %v321_v49 }
  0xf7   : > { %v681_v54 = vpop.f32.mrf.mxu0  ;;  %v745_v55 = vpop.f32.mrf.mxu1 }
  0xf8   : > { %839 = vst.msk [vmem:[#allocation2] sm:$0xff] %vm272_vm0, %v806_v52  ;;  %855 = vst.msk [vmem:[#allocation2 + $0x80] sm:$0xff] %vm272_vm0, %v822_v53  ;;  %v311_v53 = vld [vmem:[#allocation2 + $0x30] sm:$0xff] }
  0xf9   : > { %v682_v58 = vpop.f32.mrf.mxu0  ;;  %v746_v59 = vpop.f32.mrf.mxu1 }
  0xfa   : > { %v807_v60 = vadd.f32 %v682_v58, %v306_v56  ;;  %v823_v61 = vadd.f32 %v746_v59, %v322_v57  ;;  %v327_v58 = vld [vmem:[#allocation2 + $0xb0] sm:$0xff] }
  0xfb   : > { %v684_v62 = vpop.f32.mrf.mxu0  ;;  %v748_v63 = vpop.f32.mrf.mxu1 }
  0xfc   : > { %840 = vst.msk [vmem:[#allocation2 + $0x8] sm:$0xff] %vm272_vm0, %v807_v60  ;;  %856 = vst.msk [vmem:[#allocation2 + $0x88] sm:$0xff] %vm272_vm0, %v823_v61 }
  0xfd   : > { %v687_v3 = vpop.f32.mrf.mxu0  ;;  %v751_v4 = vpop.f32.mrf.mxu1 }
  0xfe   : > { %v808_v5 = vadd.f32 %v687_v3, %v307_v0  ;;  %v824_v6 = vadd.f32 %v751_v4, %v323_v1 }
  0xff   : > { %v874_v8 = vld [vmem:[#allocation2] sm:$0xff]  ;;  %v689_v10 = vpop.f32.mrf.mxu0  ;;  %v753_v11 = vpop.f32.mrf.mxu1 }
 0x100   : > { %v890_v9 = vld [vmem:[#allocation2 + $0x80] sm:$0xff]  ;;  %v913_v13 = vadd.f32 %v1707_v2, %v874_v8  ;;  %841 = vst.msk [vmem:[#allocation2 + $0x10] sm:$0xff] %vm272_vm0, %v808_v5  ;;  %857 = vst.msk [vmem:[#allocation2 + $0x90] sm:$0xff] %vm272_vm0, %v824_v6  ;;  %v312_v6 = vld [vmem:[#allocation2 + $0x38] sm:$0xff] }
 0x101   : > { %v929_v14 = vadd.f32 %v1707_v2, %v890_v9  ;;  %v690_v15 = vpop.f32.mrf.mxu0  ;;  %v754_v16 = vpop.f32.mrf.mxu1  ;;  %v328_v11 = vld [vmem:[#allocation2 + $0xb8] sm:$0xff] }
 0x102   : > { %v945_v17 = vmax.f32 %v913_v13, 0.0  ;;  %v809_v19 = vadd.f32 %v690_v15, %v308_v7  ;;  %v825_v20 = vadd.f32 %v754_v16, %v324_v12 }
 0x103   : > { %v961_v18 = vmax.f32 %v929_v14, 0.0  ;;  %v875_v22 = vld [vmem:[#allocation2 + $0x8] sm:$0xff]  ;;  %v692_v24 = vpop.f32.mrf.mxu0  ;;  %v756_v25 = vpop.f32.mrf.mxu1 }
 0x104   : > { %v891_v23 = vld [vmem:[#allocation2 + $0x88] sm:$0xff]  ;;  %v1358_v27 = vpack.c.bf16 %v945_v17, %v945_v17  ;;  %v914_v29 = vadd.f32 %v1707_v2, %v875_v22  ;;  %842 = vst.msk [vmem:[#allocation2 + $0x18] sm:$0xff] %vm272_vm0, %v809_v19  ;;  %858 = vst.msk [vmem:[#allocation2 + $0x98] sm:$0xff] %vm272_vm0, %v825_v20  ;;  %v313_v22 = vld [vmem:[#allocation2 + $0x40] sm:$0xff] }
 0x105   : > { %v1374_v28 = vpack.c.bf16 %v961_v18, %v961_v18  ;;  %v930_v30 = vadd.f32 %v1707_v2, %v891_v23  ;;  %v695_v31 = vpop.f32.mrf.mxu0  ;;  %v759_v32 = vpop.f32.mrf.mxu1 }
 0x106   : > { %1106 = vst.msk [vmem:[%s1717_s23] sm:$0xf] %vm1105_vm4, %v1358_v27  ;;  %v946_v33 = vmax.f32 %v914_v29, 0.0  ;;  %v810_v35 = vadd.f32 %v695_v31, %v309_v21  ;;  %v826_v36 = vadd.f32 %v759_v32, %v325_v26  ;;  %v329_v27 = vld [vmem:[#allocation2 + $0xc0] sm:$0xff] }
 0x107   : > { %1122 = vst.msk [vmem:[%s1717_s23 + $0x40] sm:$0xf] %vm1105_vm4, %v1374_v28  ;;  %v962_v34 = vmax.f32 %v930_v30, 0.0  ;;  %v876_v38 = vld [vmem:[#allocation2 + $0x10] sm:$0xff]  ;;  %v697_v40 = vpop.f32.mrf.mxu0  ;;  %v761_v41 = vpop.f32.mrf.mxu1 }
 0x108   : > { %v892_v39 = vld [vmem:[#allocation2 + $0x90] sm:$0xff]  ;;  %v1359_v43 = vpack.c.bf16 %v946_v33, %v946_v33  ;;  %v915_v45 = vadd.f32 %v1707_v2, %v876_v38  ;;  %843 = vst.msk [vmem:[#allocation2 + $0x20] sm:$0xff] %vm272_vm0, %v810_v35  ;;  %859 = vst.msk [vmem:[#allocation2 + $0xa0] sm:$0xff] %vm272_vm0, %v826_v36  ;;  %v314_v38 = vld [vmem:[#allocation2 + $0x48] sm:$0xff] }
 0x109   : > { %v1375_v44 = vpack.c.bf16 %v962_v34, %v962_v34  ;;  %v931_v46 = vadd.f32 %v1707_v2, %v892_v39  ;;  %v698_v47 = vpop.f32.mrf.mxu0  ;;  %v762_v48 = vpop.f32.mrf.mxu1 }
 0x10a   : > { %1107 = vst.msk [vmem:[%s1717_s23 + $0x4] sm:$0xf] %vm1105_vm4, %v1359_v43  ;;  %v947_v49 = vmax.f32 %v915_v45, 0.0  ;;  %v811_v51 = vadd.f32 %v698_v47, %v310_v37  ;;  %v827_v52 = vadd.f32 %v762_v48, %v326_v42  ;;  %v330_v43 = vld [vmem:[#allocation2 + $0xc8] sm:$0xff] }
 0x10b   : > { %1123 = vst.msk [vmem:[%s1717_s23 + $0x44] sm:$0xf] %vm1105_vm4, %v1375_v44  ;;  %v963_v50 = vmax.f32 %v931_v46, 0.0  ;;  %v877_v54 = vld [vmem:[#allocation2 + $0x18] sm:$0xff]  ;;  %v700_v56 = vpop.f32.mrf.mxu0  ;;  %v764_v57 = vpop.f32.mrf.mxu1 }
 0x10c   : > { %v893_v55 = vld [vmem:[#allocation2 + $0x98] sm:$0xff]  ;;  %v1360_v59 = vpack.c.bf16 %v947_v49, %v947_v49  ;;  %v916_v61 = vadd.f32 %v1707_v2, %v877_v54  ;;  %844 = vst.msk [vmem:[#allocation2 + $0x28] sm:$0xff] %vm272_vm0, %v811_v51  ;;  %860 = vst.msk [vmem:[#allocation2 + $0xa8] sm:$0xff] %vm272_vm0, %v827_v52  ;;  %v315_v54 = vld [vmem:[#allocation2 + $0x50] sm:$0xff] }
 0x10d   : > { %v1376_v60 = vpack.c.bf16 %v963_v50, %v963_v50  ;;  %v932_v62 = vadd.f32 %v1707_v2, %v893_v55  ;;  %v703_v63 = vpop.f32.mrf.mxu0  ;;  %v767_v0 = vpop.f32.mrf.mxu1 }
 0x10e   : > { %1108 = vst.msk [vmem:[%s1717_s23 + $0x8] sm:$0xf] %vm1105_vm4, %v1360_v59  ;;  %v948_v1 = vmax.f32 %v916_v61, 0.0  ;;  %v812_v4 = vadd.f32 %v703_v63, %v311_v53  ;;  %v828_v5 = vadd.f32 %v767_v0, %v327_v58  ;;  %v331_v59 = vld [vmem:[#allocation2 + $0xd0] sm:$0xff] }
 0x10f   : > { %1124 = vst.msk [vmem:[%s1717_s23 + $0x48] sm:$0xf] %vm1105_vm4, %v1376_v60  ;;  %v964_v3 = vmax.f32 %v932_v62, 0.0  ;;  %v878_v7 = vld [vmem:[#allocation2 + $0x20] sm:$0xff]  ;;  %v705_v9 = vpop.f32.mrf.mxu0  ;;  %v769_v10 = vpop.f32.mrf.mxu1 }
 0x110   : > { %v894_v8 = vld [vmem:[#allocation2 + $0xa0] sm:$0xff]  ;;  %v1361_v12 = vpack.c.bf16 %v948_v1, %v948_v1  ;;  %v917_v14 = vadd.f32 %v1707_v2, %v878_v7  ;;  %845 = vst.msk [vmem:[#allocation2 + $0x30] sm:$0xff] %vm272_vm0, %v812_v4  ;;  %861 = vst.msk [vmem:[#allocation2 + $0xb0] sm:$0xff] %vm272_vm0, %v828_v5  ;;  %v316_v7 = vld [vmem:[#allocation2 + $0x58] sm:$0xff] }
 0x111   : > { %v1377_v13 = vpack.c.bf16 %v964_v3, %v964_v3  ;;  %v933_v15 = vadd.f32 %v1707_v2, %v894_v8  ;;  %v706_v16 = vpop.f32.mrf.mxu0  ;;  %v770_v17 = vpop.f32.mrf.mxu1 }
 0x112   : > { %1109 = vst.msk [vmem:[%s1717_s23 + $0xc] sm:$0xf] %vm1105_vm4, %v1361_v12  ;;  %v949_v18 = vmax.f32 %v917_v14, 0.0  ;;  %v813_v20 = vadd.f32 %v706_v16, %v312_v6  ;;  %v829_v21 = vadd.f32 %v770_v17, %v328_v11  ;;  %v332_v12 = vld [vmem:[#allocation2 + $0xd8] sm:$0xff] }
 0x113   : > { %1125 = vst.msk [vmem:[%s1717_s23 + $0x4c] sm:$0xf] %vm1105_vm4, %v1377_v13  ;;  %v965_v19 = vmax.f32 %v933_v15, 0.0  ;;  %v879_v23 = vld [vmem:[#allocation2 + $0x28] sm:$0xff]  ;;  %v708_v25 = vpop.f32.mrf.mxu0  ;;  %v772_v26 = vpop.f32.mrf.mxu1 }
 0x114   : > { %v895_v24 = vld [vmem:[#allocation2 + $0xa8] sm:$0xff]  ;;  %v1362_v28 = vpack.c.bf16 %v949_v18, %v949_v18  ;;  %v918_v30 = vadd.f32 %v1707_v2, %v879_v23  ;;  %846 = vst.msk [vmem:[#allocation2 + $0x38] sm:$0xff] %vm272_vm0, %v813_v20  ;;  %862 = vst.msk [vmem:[#allocation2 + $0xb8] sm:$0xff] %vm272_vm0, %v829_v21  ;;  %v317_v23 = vld [vmem:[#allocation2 + $0x60] sm:$0xff] }
 0x115   : > { %v1378_v29 = vpack.c.bf16 %v965_v19, %v965_v19  ;;  %v934_v31 = vadd.f32 %v1707_v2, %v895_v24  ;;  %v711_v32 = vpop.f32.mrf.mxu0  ;;  %v775_v33 = vpop.f32.mrf.mxu1 }
 0x116   : > { %1110 = vst.msk [vmem:[%s1717_s23 + $0x10] sm:$0xf] %vm1105_vm4, %v1362_v28  ;;  %v950_v34 = vmax.f32 %v918_v30, 0.0  ;;  %v814_v36 = vadd.f32 %v711_v32, %v313_v22  ;;  %v830_v37 = vadd.f32 %v775_v33, %v329_v27  ;;  %v333_v28 = vld [vmem:[#allocation2 + $0xe0] sm:$0xff] }
 0x117   : > { %1126 = vst.msk [vmem:[%s1717_s23 + $0x50] sm:$0xf] %vm1105_vm4, %v1378_v29  ;;  %v966_v35 = vmax.f32 %v934_v31, 0.0  ;;  %v880_v39 = vld [vmem:[#allocation2 + $0x30] sm:$0xff]  ;;  %v713_v41 = vpop.f32.mrf.mxu0  ;;  %v777_v42 = vpop.f32.mrf.mxu1 }
 0x118   : > { %v896_v40 = vld [vmem:[#allocation2 + $0xb0] sm:$0xff]  ;;  %v1363_v44 = vpack.c.bf16 %v950_v34, %v950_v34  ;;  %v919_v46 = vadd.f32 %v1707_v2, %v880_v39  ;;  %847 = vst.msk [vmem:[#allocation2 + $0x40] sm:$0xff] %vm272_vm0, %v814_v36  ;;  %863 = vst.msk [vmem:[#allocation2 + $0xc0] sm:$0xff] %vm272_vm0, %v830_v37  ;;  %v318_v39 = vld [vmem:[#allocation2 + $0x68] sm:$0xff] }
 0x119   : > { %v1379_v45 = vpack.c.bf16 %v966_v35, %v966_v35  ;;  %v935_v47 = vadd.f32 %v1707_v2, %v896_v40  ;;  %v714_v48 = vpop.f32.mrf.mxu0  ;;  %v778_v49 = vpop.f32.mrf.mxu1 }
 0x11a   : > { %1111 = vst.msk [vmem:[%s1717_s23 + $0x14] sm:$0xf] %vm1105_vm4, %v1363_v44  ;;  %v951_v50 = vmax.f32 %v919_v46, 0.0  ;;  %v815_v52 = vadd.f32 %v714_v48, %v314_v38  ;;  %v831_v53 = vadd.f32 %v778_v49, %v330_v43  ;;  %v334_v44 = vld [vmem:[#allocation2 + $0xe8] sm:$0xff] }
 0x11b   : > { %1127 = vst.msk [vmem:[%s1717_s23 + $0x54] sm:$0xf] %vm1105_vm4, %v1379_v45  ;;  %v967_v51 = vmax.f32 %v935_v47, 0.0  ;;  %v881_v55 = vld [vmem:[#allocation2 + $0x38] sm:$0xff]  ;;  %v716_v57 = vpop.f32.mrf.mxu0  ;;  %v780_v58 = vpop.f32.mrf.mxu1 }
 0x11c   : > { %v897_v56 = vld [vmem:[#allocation2 + $0xb8] sm:$0xff]  ;;  %v1364_v60 = vpack.c.bf16 %v951_v50, %v951_v50  ;;  %v920_v62 = vadd.f32 %v1707_v2, %v881_v55  ;;  %848 = vst.msk [vmem:[#allocation2 + $0x48] sm:$0xff] %vm272_vm0, %v815_v52  ;;  %864 = vst.msk [vmem:[#allocation2 + $0xc8] sm:$0xff] %vm272_vm0, %v831_v53  ;;  %v319_v55 = vld [vmem:[#allocation2 + $0x70] sm:$0xff] }
 0x11d   : > { %v1380_v61 = vpack.c.bf16 %v967_v51, %v967_v51  ;;  %v936_v63 = vadd.f32 %v1707_v2, %v897_v56  ;;  %v719_v0 = vpop.f32.mrf.mxu0  ;;  %v783_v1 = vpop.f32.mrf.mxu1 }
 0x11e   : > { %1112 = vst.msk [vmem:[%s1717_s23 + $0x18] sm:$0xf] %vm1105_vm4, %v1364_v60  ;;  %v952_v3 = vmax.f32 %v920_v62, 0.0  ;;  %v816_v5 = vadd.f32 %v719_v0, %v315_v54  ;;  %v832_v6 = vadd.f32 %v783_v1, %v331_v59  ;;  %v335_v60 = vld [vmem:[#allocation2 + $0xf0] sm:$0xff] }
 0x11f   : > { %1128 = vst.msk [vmem:[%s1717_s23 + $0x58] sm:$0xf] %vm1105_vm4, %v1380_v61  ;;  %v968_v4 = vmax.f32 %v936_v63, 0.0  ;;  %v882_v8 = vld [vmem:[#allocation2 + $0x40] sm:$0xff]  ;;  %v721_v10 = vpop.f32.mrf.mxu0  ;;  %v785_v11 = vpop.f32.mrf.mxu1 }
 0x120   : > { %v898_v9 = vld [vmem:[#allocation2 + $0xc0] sm:$0xff]  ;;  %v1365_v13 = vpack.c.bf16 %v952_v3, %v952_v3  ;;  %v921_v15 = vadd.f32 %v1707_v2, %v882_v8  ;;  %849 = vst.msk [vmem:[#allocation2 + $0x50] sm:$0xff] %vm272_vm0, %v816_v5  ;;  %865 = vst.msk [vmem:[#allocation2 + $0xd0] sm:$0xff] %vm272_vm0, %v832_v6  ;;  %v320_v8 = vld [vmem:[#allocation2 + $0x78] sm:$0xff] }
 0x121   : > { %v1381_v14 = vpack.c.bf16 %v968_v4, %v968_v4  ;;  %v937_v16 = vadd.f32 %v1707_v2, %v898_v9  ;;  %v722_v17 = vpop.f32.mrf.mxu0  ;;  %v786_v18 = vpop.f32.mrf.mxu1 }
 0x122   : > { %1113 = vst.msk [vmem:[%s1717_s23 + $0x1c] sm:$0xf] %vm1105_vm4, %v1365_v13  ;;  %v953_v19 = vmax.f32 %v921_v15, 0.0  ;;  %v817_v21 = vadd.f32 %v722_v17, %v316_v7  ;;  %v833_v22 = vadd.f32 %v786_v18, %v332_v12  ;;  %v336_v13 = vld [vmem:[#allocation2 + $0xf8] sm:$0xff] }
 0x123   : > { %1129 = vst.msk [vmem:[%s1717_s23 + $0x5c] sm:$0xf] %vm1105_vm4, %v1381_v14  ;;  %v969_v20 = vmax.f32 %v937_v16, 0.0  ;;  %v883_v24 = vld [vmem:[#allocation2 + $0x48] sm:$0xff]  ;;  %v724_v26 = vpop.f32.mrf.mxu0  ;;  %v788_v27 = vpop.f32.mrf.mxu1 }
 0x124   : > { %v899_v25 = vld [vmem:[#allocation2 + $0xc8] sm:$0xff]  ;;  %v1366_v29 = vpack.c.bf16 %v953_v19, %v953_v19  ;;  %v922_v31 = vadd.f32 %v1707_v2, %v883_v24  ;;  %850 = vst.msk [vmem:[#allocation2 + $0x58] sm:$0xff] %vm272_vm0, %v817_v21  ;;  %866 = vst.msk [vmem:[#allocation2 + $0xd8] sm:$0xff] %vm272_vm0, %v833_v22 }
 0x125   : > { %v1382_v30 = vpack.c.bf16 %v969_v20, %v969_v20  ;;  %v938_v32 = vadd.f32 %v1707_v2, %v899_v25  ;;  %v727_v33 = vpop.f32.mrf.mxu0  ;;  %v791_v34 = vpop.f32.mrf.mxu1 }
 0x126   : > { %1114 = vst.msk [vmem:[%s1717_s23 + $0x20] sm:$0xf] %vm1105_vm4, %v1366_v29  ;;  %v954_v35 = vmax.f32 %v922_v31, 0.0  ;;  %v818_v37 = vadd.f32 %v727_v33, %v317_v23  ;;  %v834_v38 = vadd.f32 %v791_v34, %v333_v28 }
 0x127   : > { %1130 = vst.msk [vmem:[%s1717_s23 + $0x60] sm:$0xf] %vm1105_vm4, %v1382_v30  ;;  %v970_v36 = vmax.f32 %v938_v32, 0.0  ;;  %v884_v40 = vld [vmem:[#allocation2 + $0x50] sm:$0xff]  ;;  %v729_v42 = vpop.f32.mrf.mxu0  ;;  %v793_v43 = vpop.f32.mrf.mxu1 }
 0x128   : > { %v900_v41 = vld [vmem:[#allocation2 + $0xd0] sm:$0xff]  ;;  %v1367_v45 = vpack.c.bf16 %v954_v35, %v954_v35  ;;  %v923_v47 = vadd.f32 %v1707_v2, %v884_v40  ;;  %851 = vst.msk [vmem:[#allocation2 + $0x60] sm:$0xff] %vm272_vm0, %v818_v37  ;;  %867 = vst.msk [vmem:[#allocation2 + $0xe0] sm:$0xff] %vm272_vm0, %v834_v38 }
 0x129   : > { %v1383_v46 = vpack.c.bf16 %v970_v36, %v970_v36  ;;  %v939_v48 = vadd.f32 %v1707_v2, %v900_v41  ;;  %v730_v49 = vpop.f32.mrf.mxu0  ;;  %v794_v50 = vpop.f32.mrf.mxu1 }
 0x12a   : > { %1115 = vst.msk [vmem:[%s1717_s23 + $0x24] sm:$0xf] %vm1105_vm4, %v1367_v45  ;;  %v955_v51 = vmax.f32 %v923_v47, 0.0  ;;  %v819_v53 = vadd.f32 %v730_v49, %v318_v39  ;;  %v835_v54 = vadd.f32 %v794_v50, %v334_v44 }
 0x12b   : > { %1131 = vst.msk [vmem:[%s1717_s23 + $0x64] sm:$0xf] %vm1105_vm4, %v1383_v46  ;;  %v971_v52 = vmax.f32 %v939_v48, 0.0  ;;  %v885_v56 = vld [vmem:[#allocation2 + $0x58] sm:$0xff]  ;;  %v732_v58 = vpop.f32.mrf.mxu0  ;;  %v796_v59 = vpop.f32.mrf.mxu1 }
 0x12c   : > { %v901_v57 = vld [vmem:[#allocation2 + $0xd8] sm:$0xff]  ;;  %v1368_v61 = vpack.c.bf16 %v955_v51, %v955_v51  ;;  %v924_v63 = vadd.f32 %v1707_v2, %v885_v56  ;;  %852 = vst.msk [vmem:[#allocation2 + $0x68] sm:$0xff] %vm272_vm0, %v819_v53  ;;  %868 = vst.msk [vmem:[#allocation2 + $0xe8] sm:$0xff] %vm272_vm0, %v835_v54 }
 0x12d   : > { %v1384_v62 = vpack.c.bf16 %v971_v52, %v971_v52  ;;  %v940_v0 = vadd.f32 %v1707_v2, %v901_v57  ;;  %v735_v1 = vpop.f32.mrf.mxu0  ;;  %v799_v3 = vpop.f32.mrf.mxu1 }
 0x12e   : > { %1116 = vst.msk [vmem:[%s1717_s23 + $0x28] sm:$0xf] %vm1105_vm4, %v1368_v61  ;;  %v956_v4 = vmax.f32 %v924_v63, 0.0  ;;  %v820_v6 = vadd.f32 %v735_v1, %v319_v55  ;;  %v836_v7 = vadd.f32 %v799_v3, %v335_v60 }
 0x12f   : > { %1132 = vst.msk [vmem:[%s1717_s23 + $0x68] sm:$0xf] %vm1105_vm4, %v1384_v62  ;;  %v972_v5 = vmax.f32 %v940_v0, 0.0  ;;  %v886_v9 = vld [vmem:[#allocation2 + $0x60] sm:$0xff]  ;;  %v737_v11 = vpop.f32.mrf.mxu0  ;;  %v801_v12 = vpop.f32.mrf.mxu1 }
 0x130   : > { %v902_v10 = vld [vmem:[#allocation2 + $0xe0] sm:$0xff]  ;;  %v1369_v14 = vpack.c.bf16 %v956_v4, %v956_v4  ;;  %v925_v16 = vadd.f32 %v1707_v2, %v886_v9  ;;  %853 = vst.msk [vmem:[#allocation2 + $0x70] sm:$0xff] %vm272_vm0, %v820_v6  ;;  %869 = vst.msk [vmem:[#allocation2 + $0xf0] sm:$0xff] %vm272_vm0, %v836_v7 }
 0x131   : > { %v1385_v15 = vpack.c.bf16 %v972_v5, %v972_v5  ;;  %v941_v17 = vadd.f32 %v1707_v2, %v902_v10  ;;  %v738_v18 = vpop.f32.mrf.mxu0  ;;  %v802_v19 = vpop.f32.mrf.mxu1 }
 0x132   : > { %1117 = vst.msk [vmem:[%s1717_s23 + $0x2c] sm:$0xf] %vm1105_vm4, %v1369_v14  ;;  %v957_v20 = vmax.f32 %v925_v16, 0.0  ;;  %v821_v22 = vadd.f32 %v738_v18, %v320_v8  ;;  %v837_v23 = vadd.f32 %v802_v19, %v336_v13 }
 0x133   : > { %1133 = vst.msk [vmem:[%s1717_s23 + $0x6c] sm:$0xf] %vm1105_vm4, %v1385_v15  ;;  %v973_v21 = vmax.f32 %v941_v17, 0.0  ;;  %v887_v24 = vld [vmem:[#allocation2 + $0x68] sm:$0xff]  ;;  %v740_v26 = vpop.f32.mrf.mxu0  ;;  %v804_v27 = vpop.f32.mrf.mxu1 }
 0x134   : > { %v903_v25 = vld [vmem:[#allocation2 + $0xe8] sm:$0xff]  ;;  %v1370_v28 = vpack.c.bf16 %v957_v20, %v957_v20  ;;  %v926_v30 = vadd.f32 %v1707_v2, %v887_v24  ;;  %854 = vst.msk [vmem:[#allocation2 + $0x78] sm:$0xff] %vm272_vm0, %v821_v22  ;;  %870 = vst.msk [vmem:[#allocation2 + $0xf8] sm:$0xff] %vm272_vm0, %v837_v23 }
 0x135   : > { %v1386_v29 = vpack.c.bf16 %v973_v21, %v973_v21  ;;  %v942_v31 = vadd.f32 %v1707_v2, %v903_v25 }
 0x136   : > { %1118 = vst.msk [vmem:[%s1717_s23 + $0x30] sm:$0xf] %vm1105_vm4, %v1370_v28  ;;  %v958_v32 = vmax.f32 %v926_v30, 0.0 }
 0x137   : > { %1134 = vst.msk [vmem:[%s1717_s23 + $0x70] sm:$0xf] %vm1105_vm4, %v1386_v29  ;;  %v974_v33 = vmax.f32 %v942_v31, 0.0  ;;  %v888_v34 = vld [vmem:[#allocation2 + $0x70] sm:$0xff] }
 0x138   : > { %v904_v35 = vld [vmem:[#allocation2 + $0xf0] sm:$0xff]  ;;  %v1371_v36 = vpack.c.bf16 %v958_v32, %v958_v32  ;;  %v927_v38 = vadd.f32 %v1707_v2, %v888_v34 }
 0x139   : > { %v1387_v37 = vpack.c.bf16 %v974_v33, %v974_v33  ;;  %v943_v39 = vadd.f32 %v1707_v2, %v904_v35 }
 0x13a   : > { %1119 = vst.msk [vmem:[%s1717_s23 + $0x34] sm:$0xf] %vm1105_vm4, %v1371_v36  ;;  %v959_v40 = vmax.f32 %v927_v38, 0.0 }
 0x13b   : > { %1135 = vst.msk [vmem:[%s1717_s23 + $0x74] sm:$0xf] %vm1105_vm4, %v1387_v37  ;;  %v975_v41 = vmax.f32 %v943_v39, 0.0  ;;  %v889_v42 = vld [vmem:[#allocation2 + $0x78] sm:$0xff] }
 0x13c   : > { %v905_v43 = vld [vmem:[#allocation2 + $0xf8] sm:$0xff]  ;;  %v1372_v44 = vpack.c.bf16 %v959_v40, %v959_v40  ;;  %v928_v46 = vadd.f32 %v1707_v2, %v889_v42 }
 0x13d   : > { %v1388_v45 = vpack.c.bf16 %v975_v41, %v975_v41  ;;  %v944_v47 = vadd.f32 %v1707_v2, %v905_v43 }
 0x13e   : > { %1120 = vst.msk [vmem:[%s1717_s23 + $0x38] sm:$0xf] %vm1105_vm4, %v1372_v44  ;;  %v960_v48 = vmax.f32 %v928_v46, 0.0 }
 0x13f   : > { %1136 = vst.msk [vmem:[%s1717_s23 + $0x78] sm:$0xf] %vm1105_vm4, %v1388_v45  ;;  %v976_v49 = vmax.f32 %v944_v47, 0.0 }
 0x140   : > { %v1373_v50 = vpack.c.bf16 %v960_v48, %v960_v48 }
 0x141   : > { %v1389_v51 = vpack.c.bf16 %v976_v49, %v976_v49 }
 0x142   : > { %1121 = vst.msk [vmem:[%s1717_s23 + $0x3c] sm:$0xf] %vm1105_vm4, %v1373_v50 }
 0x143   : > { %1137 = vst.msk [vmem:[%s1717_s23 + $0x7c] sm:$0xf] %vm1105_vm4, %v1389_v51 }
 0x144 PF: > { %s13_s14 = sadd.s32 1, %s1517_s14   ;;  %s1852_s12 = smov %s1513_s13 }
 0x145   : > { %p10_p5 = scmp.ge.s32.totalorder %s13_s14, 4   ;;  %s1853_s13 = smov %s1855_s15 }
 0x147   :  { %12 = sbr.rel (!%p10_p5) target bundleno = 2 (0x2), region = 76 }

</bundles_post_ra>
